<compile_context>
chip_gen: v5e
topology: v5e:2x2
jax: 0.10.0
libtpu: 0.0.40
codegen_flags: <defaults>
</compile_context>

<pallas_src>
import jax
import jax.numpy as jnp
import numpy as np
from jax.experimental import pallas as pl
from jax.experimental.pallas import tpu as pltpu

# Hyperparameters (match Encoder_conv_deep defaults)
N_SENSORS = 180
K1, S1, P1 = 45, 15, 15          # conv1: kernel / stride / circular padding
LEN_CONV = 12                    # ((180 + 2*15) - 45)//15 + 1 = 12
LATENT = 12
EPS_WEIGHT = 1.0

# Packed-parameter layout (rows of the single (WB_ROWS, WB_COLS) weight operand).
WB_COLS = LEN_CONV * 3           # 36 -- every layer's output padded to this width
_R_W1 = 0                        # rows   0:180  conv1 circulant band (180, 36)
_R_W2 = 184                      # rows 184:220  conv2 band (36, 24) zero-padded to (36, 36)
_R_W3 = 224                      # rows 224:260  conv3 band (24, 12) zero-padded to (36, 36)
_R_WF = 264                      # rows 264:300  [fc_mu | fc_logvar] (12, 24) zero-padded
_R_B1, _R_B2, _R_B3, _R_BF = 304, 312, 320, 328   # bias rows (each (1, 36))
WB_ROWS = 336


def _encoder_kernel(x_ref, wb_ref, eps_ref, mu_ref, lv_ref, z_ref):
    f32 = jnp.float32
    x = x_ref[...].astype(f32)                            # (TB, 180)

    w1 = wb_ref[_R_W1:_R_W1 + N_SENSORS, :]               # (180, 36) conv1 (circular pad baked in)
    w2 = wb_ref[_R_W2:_R_W2 + WB_COLS, :]                 # (36, 36)  conv2 band
    w3 = wb_ref[_R_W3:_R_W3 + WB_COLS, :]                 # (36, 36)  conv3 band
    wf = wb_ref[_R_WF:_R_WF + WB_COLS, :]                 # (36, 36)  fused fc_mu | fc_logvar
    b1 = wb_ref[_R_B1:_R_B1 + 1, :]                       # (1, 36) biases, pre-tiled to output width
    b2 = wb_ref[_R_B2:_R_B2 + 1, :]
    b3 = wb_ref[_R_B3:_R_B3 + 1, :]
    bf = wb_ref[_R_BF:_R_BF + 1, :]

    # conv1 + ReLU, conv2 + ReLU, conv3 (no ReLU), fused fc_mu/fc_logvar + ReLU
    h = jnp.maximum(jnp.dot(x, w1, preferred_element_type=f32) + b1, 0.0)    # (TB, 36)
    h = jnp.maximum(jnp.dot(h, w2, preferred_element_type=f32) + b2, 0.0)    # (TB, 36) (cols 24:36 == 0)
    h = jnp.dot(h, w3, preferred_element_type=f32) + b3                      # (TB, 36) (cols 12:36 == 0)
    fc = jnp.maximum(jnp.dot(h, wf, preferred_element_type=f32) + bf, 0.0)   # (TB, 36) = [mu | log_var | 0]

    mu = fc[:, :LATENT]
    lv = fc[:, LATENT:2 * LATENT]
    z = mu + eps_ref[...].astype(f32) * jnp.exp(0.5 * lv)                    # reparameterize

    mu_ref[...] = mu
    lv_ref[...] = lv
    z_ref[...] = z


def _circular_conv_band(w, in_len, *, stride, pad):
    """Banded matrix for a circular-padded strided Conv1d.

    w: (C_out, C_in, K) PyTorch layout.  Returns (in_len*C_in, out_len*C_out)
    such that flat_out = flat_in @ band, with position-major / channel-minor
    flattening on both sides (wraparound baked into the rows)."""
    c_out, c_in, k = w.shape
    out_len = (in_len + 2 * pad - k) // stride + 1
    shape = (out_len, k, c_in, c_out)
    t = np.arange(out_len).reshape(-1, 1, 1, 1)
    j = np.arange(k).reshape(1, -1, 1, 1)
    ci = np.arange(c_in).reshape(1, 1, -1, 1)
    co = np.arange(c_out).reshape(1, 1, 1, -1)
    rows = np.broadcast_to(((t * stride - pad + j) % in_len) * c_in + ci, shape).reshape(-1)
    cols = np.broadcast_to(t * c_out + co, shape).reshape(-1)
    vals = jnp.broadcast_to(jnp.transpose(w, (2, 1, 0))[None], shape).reshape(-1)
    band = jnp.zeros((in_len * c_in, out_len * c_out), jnp.float32)
    return band.at[rows, cols].add(vals)


def pack_encoder_params(params):
    """Pack all conv/FC weights & biases into one (WB_ROWS, WB_COLS) f32 operand."""
    w1b = _circular_conv_band(params['w1'], N_SENSORS, stride=S1, pad=P1)    # (180, 36)
    w2b = _circular_conv_band(params['w2'], LEN_CONV, stride=1, pad=1)       # (36, 24)
    w3b = _circular_conv_band(params['w3'], LEN_CONV, stride=1, pad=1)       # (24, 12)
    wfc = jnp.concatenate([params['wmu'].T, params['wlv'].T], axis=1)        # (12, 24)

    wb = jnp.zeros((WB_ROWS, WB_COLS), jnp.float32)
    wb = wb.at[_R_W1:_R_W1 + w1b.shape[0], :w1b.shape[1]].set(w1b)
    wb = wb.at[_R_W2:_R_W2 + w2b.shape[0], :w2b.shape[1]].set(w2b)
    wb = wb.at[_R_W3:_R_W3 + w3b.shape[0], :w3b.shape[1]].set(w3b)
    wb = wb.at[_R_WF:_R_WF + wfc.shape[0], :wfc.shape[1]].set(wfc)
    wb = wb.at[_R_B1, :3 * LEN_CONV].set(jnp.tile(params['b1'], LEN_CONV))
    wb = wb.at[_R_B2, :2 * LEN_CONV].set(jnp.tile(params['b2'], LEN_CONV))
    wb = wb.at[_R_B3, :1 * LEN_CONV].set(jnp.tile(params['b3'], LEN_CONV))
    wb = wb.at[_R_BF, :2 * LATENT].set(jnp.concatenate([params['bmu'], params['blv']]))
    return wb


def _round_up(n, m):
    return -(-n // m) * m


def encoder_conv_deep_forward(x, params, eps, *, tile_b=1024, stream_dtype=jnp.float32):
    """x: (B, 1, N_SENSORS) f32 (PyTorch NCL). Returns (mu, log_var, z), each (B, 1, LATENT)."""
    B = x.shape[0]
    xs = x.reshape(B, N_SENSORS).astype(stream_dtype)     # circular pad lives in the W1 band
    wb = pack_encoder_params(params)

    # Batch tiling: tile must be a multiple of the sublane tile (8 f32 / 16 bf16);
    # pad B so the grid divides evenly, slice the pad back off afterwards.
    align = 16 if stream_dtype == jnp.bfloat16 else 8
    tb = min(_round_up(tile_b, align), _round_up(B, align))
    bp = _round_up(B, tb)
    eps_p = eps
    if bp != B:
        xs = jnp.pad(xs, ((0, bp - B), (0, 0)))
        eps_p = jnp.pad(eps, ((0, bp - B), (0, 0)))

    out_sds = jax.ShapeDtypeStruct((bp, LATENT), jnp.float32)
    x_spec = pl.BlockSpec((tb, N_SENSORS), lambda i: (i, 0))
    lat_spec = pl.BlockSpec((tb, LATENT), lambda i: (i, 0))
    w_spec = pl.BlockSpec((WB_ROWS, WB_COLS), lambda i: (0, 0))   # resident across grid steps

    mu, lv, z = pl.pallas_call(
        _encoder_kernel,
        out_shape=(out_sds, out_sds, out_sds),
        grid=(bp // tb,),
        in_specs=[x_spec, w_spec, lat_spec],
        out_specs=(lat_spec, lat_spec, lat_spec),
        compiler_params=pltpu.CompilerParams(
            dimension_semantics=("parallel",),   # shard batch tiles across TensorCores (v7x)
        ),
    )(xs, wb, eps_p)

    if bp != B:
        mu, lv, z = mu[:B], lv[:B], z[:B]
    return mu[:, None, :], lv[:, None, :], z[:, None, :]


def init_params(key):
    """Deterministic PyTorch-layout parameters (uniform(-1/sqrt(fan_in), +...))."""
    ks = jax.random.split(key, 10)

    def u(k, shape, fan_in):
        b = 1.0 / np.sqrt(fan_in)
        return jax.random.uniform(k, shape, jnp.float32, -b, b)

    return {
        'w1': u(ks[0], (3, 1, 45), 45), 'b1': u(ks[1], (3,), 45),
        'w2': u(ks[2], (2, 3, 3), 9),   'b2': u(ks[3], (2,), 9),
        'w3': u(ks[4], (1, 2, 3), 6),   'b3': u(ks[5], (1,), 6),
        'wmu': u(ks[6], (LATENT, LATENT), LATENT), 'bmu': u(ks[7], (LATENT,), LATENT),
        'wlv': u(ks[8], (LATENT, LATENT), LATENT), 'blv': u(ks[9], (LATENT,), LATENT),
    }


def reference_forward(x, params, eps):
    """Independent plain-JAX reference (lax.conv_general_dilated) for validation."""
    relu = lambda a: jnp.maximum(a, 0.0)
    circ = lambda h, p: jnp.concatenate([h[..., -p:], h, h[..., :p]], axis=-1)
    dn = ('NCH', 'OIH', 'NCH')
    h = jax.lax.conv_general_dilated(circ(x, P1), params['w1'], (S1,), 'VALID',
                                     dimension_numbers=dn)
    h = relu(h + params['b1'][None, :, None])
    h = jax.lax.conv_general_dilated(circ(h, 1), params['w2'], (1,), 'VALID',
                                     dimension_numbers=dn)
    h = relu(h + params['b2'][None, :, None])
    h = jax.lax.conv_general_dilated(circ(h, 1), params['w3'], (1,), 'VALID',
                                     dimension_numbers=dn)
    h = h + params['b3'][None, :, None]                 # (B, 1, 12)
    mu = relu(h @ params['wmu'].T + params['bmu'])
    lv = relu(h @ params['wlv'].T + params['blv'])
    z = mu + eps[:, None, :] * jnp.exp(0.5 * lv)
    return mu, lv, z


if __name__ == "__main__":
    key = jax.random.PRNGKey(0)
    kx, keps, kp = jax.random.split(key, 3)
    B = 2
    x = jax.random.normal(kx, (B, 1, N_SENSORS), jnp.float32)
    # TODO(synk): torch.distributions.Normal sampling has no in-kernel equivalent;
    # the Gaussian noise is drawn deterministically here and fed to the kernel.
    eps = EPS_WEIGHT * jax.random.normal(keps, (B, LATENT), jnp.float32)
    params = init_params(kp)

    fwd = jax.jit(encoder_conv_deep_forward)
    mu, lv, z = jax.block_until_ready(fwd(x, params, eps))

    mu_r, lv_r, z_r = reference_forward(x, params, eps)
    np.testing.assert_allclose(np.asarray(mu), np.asarray(mu_r), rtol=2e-2, atol=2e-2)
    np.testing.assert_allclose(np.asarray(lv), np.asarray(lv_r), rtol=2e-2, atol=2e-2)
    np.testing.assert_allclose(np.asarray(z),  np.asarray(z_r),  rtol=2e-2, atol=2e-2)
    print("KERNEL_OK")
</pallas_src>

<mosaic_0001>
module attributes {stable_mosaic.version = 11 : i64} {
  func.func @_encoder_kernel(%arg0: i32, %arg1: memref<8x180xf32, #tpu.memory_space<vmem>>, %arg2: memref<336x36xf32, #tpu.memory_space<vmem>>, %arg3: memref<8x12xf32, #tpu.memory_space<vmem>>, %arg4: memref<8x12xf32, #tpu.memory_space<vmem>>, %arg5: memref<8x12xf32, #tpu.memory_space<vmem>>, %arg6: memref<8x12xf32, #tpu.memory_space<vmem>>) attributes {dimension_semantics = [#tpu.dimension_semantics<parallel>], iteration_bounds = array<i64: 1>, scalar_prefetch = 0 : i64, scratch_operands = 0 : i64, tpu.core_type = #tpu.core_type<tc>, window_params = [{transform_indices = @transform_0, window_bounds = array<i64: 8, 180>}, {pipeline_mode = #tpu.pipeline_mode<synchronous>, transform_indices = @transform_1, window_bounds = array<i64: 336, 36>}, {transform_indices = @transform_2, window_bounds = array<i64: 8, 12>}, {transform_indices = @transform_3, window_bounds = array<i64: 8, 12>}, {transform_indices = @transform_4, window_bounds = array<i64: 8, 12>}, {transform_indices = @transform_5, window_bounds = array<i64: 8, 12>}]} {
    %c0 = arith.constant 0 : index
    %c0_0 = arith.constant 0 : index
    %0 = vector.load %arg1[%c0, %c0_0] : memref<8x180xf32, #tpu.memory_space<vmem>>, vector<8x180xf32>
    %c0_1 = arith.constant 0 : index
    %c0_2 = arith.constant 0 : index
    %1 = vector.load %arg2[%c0_1, %c0_2] : memref<336x36xf32, #tpu.memory_space<vmem>>, vector<180x36xf32>
    %c184 = arith.constant 184 : index
    %c0_3 = arith.constant 0 : index
    %2 = vector.load %arg2[%c184, %c0_3] : memref<336x36xf32, #tpu.memory_space<vmem>>, vector<36x36xf32>
    %c224 = arith.constant 224 : index
    %c0_4 = arith.constant 0 : index
    %3 = vector.load %arg2[%c224, %c0_4] : memref<336x36xf32, #tpu.memory_space<vmem>>, vector<36x36xf32>
    %c264 = arith.constant 264 : index
    %c0_5 = arith.constant 0 : index
    %4 = vector.load %arg2[%c264, %c0_5] : memref<336x36xf32, #tpu.memory_space<vmem>>, vector<36x36xf32>
    %c304 = arith.constant 304 : index
    %c0_6 = arith.constant 0 : index
    %5 = vector.load %arg2[%c304, %c0_6] : memref<336x36xf32, #tpu.memory_space<vmem>>, vector<1x36xf32>
    %c312 = arith.constant 312 : index
    %c0_7 = arith.constant 0 : index
    %6 = vector.load %arg2[%c312, %c0_7] : memref<336x36xf32, #tpu.memory_space<vmem>>, vector<1x36xf32>
    %c320 = arith.constant 320 : index
    %c0_8 = arith.constant 0 : index
    %7 = vector.load %arg2[%c320, %c0_8] : memref<336x36xf32, #tpu.memory_space<vmem>>, vector<1x36xf32>
    %c328 = arith.constant 328 : index
    %c0_9 = arith.constant 0 : index
    %8 = vector.load %arg2[%c328, %c0_9] : memref<336x36xf32, #tpu.memory_space<vmem>>, vector<1x36xf32>
    %cst = arith.constant dense<0.000000e+00> : vector<8x36xf32>
    %9 = tpu.matmul %0, %1, %cst {dimension_numbers = #tpu.dot_dimension_numbers<[1], [0], [0], [1], [0, 0, 1, 1], [], []>} : vector<8x180xf32>, vector<180x36xf32>, vector<8x36xf32> -> vector<8x36xf32>
    %10 = vector.broadcast %5 : vector<1x36xf32> to vector<8x36xf32>
    %11 = arith.addf %9, %10 : vector<8x36xf32>
    %cst_10 = arith.constant 0.000000e+00 : f32
    %12 = vector.broadcast %cst_10 : f32 to vector<8x36xf32>
    %13 = arith.maximumf %11, %12 : vector<8x36xf32>
    %cst_11 = arith.constant dense<0.000000e+00> : vector<8x36xf32>
    %14 = tpu.matmul %13, %2, %cst_11 {dimension_numbers = #tpu.dot_dimension_numbers<[1], [0], [0], [1], [0, 0, 1, 1], [], []>} : vector<8x36xf32>, vector<36x36xf32>, vector<8x36xf32> -> vector<8x36xf32>
    %15 = vector.broadcast %6 : vector<1x36xf32> to vector<8x36xf32>
    %16 = arith.addf %14, %15 : vector<8x36xf32>
    %cst_12 = arith.constant 0.000000e+00 : f32
    %17 = vector.broadcast %cst_12 : f32 to vector<8x36xf32>
    %18 = arith.maximumf %16, %17 : vector<8x36xf32>
    %cst_13 = arith.constant dense<0.000000e+00> : vector<8x36xf32>
    %19 = tpu.matmul %18, %3, %cst_13 {dimension_numbers = #tpu.dot_dimension_numbers<[1], [0], [0], [1], [0, 0, 1, 1], [], []>} : vector<8x36xf32>, vector<36x36xf32>, vector<8x36xf32> -> vector<8x36xf32>
    %20 = vector.broadcast %7 : vector<1x36xf32> to vector<8x36xf32>
    %21 = arith.addf %19, %20 : vector<8x36xf32>
    %cst_14 = arith.constant dense<0.000000e+00> : vector<8x36xf32>
    %22 = tpu.matmul %21, %4, %cst_14 {dimension_numbers = #tpu.dot_dimension_numbers<[1], [0], [0], [1], [0, 0, 1, 1], [], []>} : vector<8x36xf32>, vector<36x36xf32>, vector<8x36xf32> -> vector<8x36xf32>
    %23 = vector.broadcast %8 : vector<1x36xf32> to vector<8x36xf32>
    %24 = arith.addf %22, %23 : vector<8x36xf32>
    %cst_15 = arith.constant 0.000000e+00 : f32
    %25 = vector.broadcast %cst_15 : f32 to vector<8x36xf32>
    %26 = arith.maximumf %24, %25 : vector<8x36xf32>
    %27 = vector.extract_strided_slice %26 {offsets = [0, 0], sizes = [8, 12], strides = [1, 1]} : vector<8x36xf32> to vector<8x12xf32>
    %28 = vector.extract_strided_slice %26 {offsets = [0, 12], sizes = [8, 12], strides = [1, 1]} : vector<8x36xf32> to vector<8x12xf32>
    %c0_16 = arith.constant 0 : index
    %c0_17 = arith.constant 0 : index
    %29 = vector.load %arg3[%c0_16, %c0_17] : memref<8x12xf32, #tpu.memory_space<vmem>>, vector<8x12xf32>
    %cst_18 = arith.constant 5.000000e-01 : f32
    %30 = vector.broadcast %cst_18 : f32 to vector<8x12xf32>
    %31 = arith.mulf %30, %28 : vector<8x12xf32>
    %32 = math.exp %31 : vector<8x12xf32>
    %33 = arith.mulf %29, %32 : vector<8x12xf32>
    %34 = arith.addf %27, %33 : vector<8x12xf32>
    %c0_19 = arith.constant 0 : index
    %c0_20 = arith.constant 0 : index
    %35 = vector.load %arg4[%c0_19, %c0_20] : memref<8x12xf32, #tpu.memory_space<vmem>>, vector<8x12xf32>
    tpu.vector_store %arg4[%c0_19, %c0_20], %27 {strides = array<i32>} : memref<8x12xf32, #tpu.memory_space<vmem>>, vector<8x12xf32>,
    %c0_21 = arith.constant 0 : index
    %c0_22 = arith.constant 0 : index
    %36 = vector.load %arg5[%c0_21, %c0_22] : memref<8x12xf32, #tpu.memory_space<vmem>>, vector<8x12xf32>
    tpu.vector_store %arg5[%c0_21, %c0_22], %28 {strides = array<i32>} : memref<8x12xf32, #tpu.memory_space<vmem>>, vector<8x12xf32>,
    %c0_23 = arith.constant 0 : index
    %c0_24 = arith.constant 0 : index
    %37 = vector.load %arg6[%c0_23, %c0_24] : memref<8x12xf32, #tpu.memory_space<vmem>>, vector<8x12xf32>
    tpu.vector_store %arg6[%c0_23, %c0_24], %34 {strides = array<i32>} : memref<8x12xf32, #tpu.memory_space<vmem>>, vector<8x12xf32>,
    return
  }
  func.func @transform_0(%arg0: i32) -> (i32, i32) {
    %c0_i32 = arith.constant 0 : i32
    %c0_i32_0 = arith.constant 0 : i32
    return %arg0, %c0_i32 : i32, i32
  }
  func.func @transform_1(%arg0: i32) -> (i32, i32) {
    %c0_i32 = arith.constant 0 : i32
    %c0_i32_0 = arith.constant 0 : i32
    %c0_i32_1 = arith.constant 0 : i32
    return %c0_i32, %c0_i32_0 : i32, i32
  }
  func.func @transform_2(%arg0: i32) -> (i32, i32) {
    %c0_i32 = arith.constant 0 : i32
    %c0_i32_0 = arith.constant 0 : i32
    return %arg0, %c0_i32 : i32, i32
  }
  func.func @transform_3(%arg0: i32) -> (i32, i32) {
    %c0_i32 = arith.constant 0 : i32
    %c0_i32_0 = arith.constant 0 : i32
    return %arg0, %c0_i32 : i32, i32
  }
  func.func @transform_4(%arg0: i32) -> (i32, i32) {
    %c0_i32 = arith.constant 0 : i32
    %c0_i32_0 = arith.constant 0 : i32
    return %arg0, %c0_i32 : i32, i32
  }
  func.func @transform_5(%arg0: i32) -> (i32, i32) {
    %c0_i32 = arith.constant 0 : i32
    %c0_i32_0 = arith.constant 0 : i32
    return %arg0, %c0_i32 : i32, i32
  }
}

</mosaic_0001>

<bundles_post_ra>
// kernel: tile.18
= control target key start
LH: loop header
LB: loop body
LE: loop exit
PB: predicated region body
PF: predicated region fallthrough
CT: control target
= control target key end

     0   :  { %s28_s0 = inlined_call_operand.vmem [shape: f32[3], index: 0, kind: input, shape index: {}]   ;;  %s29_s1 = inlined_call_operand.vmem [shape: f32[12,3], index: 1, kind: output, shape index: {}]  }
   0x1   :  { %v4_v0 = vld [vmem:[%s28_s0] ss:$0 sm:$0xff] }
   0x2   :  { %5 = vst [vmem:[%s29_s1] sm:$0xff] %v4_v0 }
   0x3   :  { %8 = vst [vmem:[%s29_s1 + $0x8] sm:$0xff] %v4_v0 }

// kernel: tile.23
= control target key start
LH: loop header
LB: loop body
LE: loop exit
PB: predicated region body
PF: predicated region fallthrough
CT: control target
= control target key end

     0   :  { %s28_s0 = inlined_call_operand.vmem [shape: f32[2], index: 0, kind: input, shape index: {}]   ;;  %s29_s1 = inlined_call_operand.vmem [shape: f32[12,2], index: 1, kind: output, shape index: {}]  }
   0x1   :  { %v4_v0 = vld [vmem:[%s28_s0] ss:$0 sm:$0xff] }
   0x2   :  { %5 = vst [vmem:[%s29_s1] sm:$0xff] %v4_v0 }
   0x3   :  { %8 = vst [vmem:[%s29_s1 + $0x8] sm:$0xff] %v4_v0 }

// kernel: encoder_conv_deep_forward.1
= control target key start
LH: loop header
LB: loop body
LE: loop exit
PB: predicated region body
PF: predicated region fallthrough
CT: control target
= control target key end

     0   :  { %vm66_vm0 = vcmask 1043456   ;;  %vm62_vm1 = vcmask 424960   ;;  %vm112_vm2 = vcmask 293888   ;;  %vm205_vm3 = vcmask 97280   ;;  %s240_s6 = smov 116   ;;  %s425_s1 = inlined_call_operand.vmem [shape: f32[336,36], index: 1, kind: input, shape index: {}]   ;;  %s426_s0 = inlined_call_operand.vmem [shape: f32[8,180], index: 0, kind: input, shape index: {}]   ;;  %s427_s3 = inlined_call_operand.vmem [shape: f32[8,12], index: 3, kind: output, shape index: {0}]   ;;  %s428_s2 = inlined_call_operand.vmem [shape: f32[8,12], index: 2, kind: input, shape index: {}]   ;;  %s429_s5 = inlined_call_operand.vmem [shape: f32[8,12], index: 5, kind: output, shape index: {2}]   ;;  %s430_s4 = inlined_call_operand.vmem [shape: f32[8,12], index: 4, kind: output, shape index: {1}]  }
   0x1   :  { %v34_v0 = vld [vmem:[%s425_s1 + $0x78] sm:$0xff]  ;;  %v33_v1 = vld [vmem:[%s425_s1 + $0x70] sm:$0xff]  ;;  %v32_v2 = vld [vmem:[%s425_s1 + $0x68] sm:$0xff] }
   0x2   :  { %70 = vmatpush.msra.mxu0 %v34_v0  ;;  %v41_v3 = vld [vmem:[%s425_s1 + $0xb0] sm:$0xf]  ;;  %v31_v4 = vld [vmem:[%s425_s1 + $0x60] sm:$0xff]  ;;  %v40_v5 = vld [vmem:[%s425_s1 + $0xa8] sm:$0xff] }
   0x3   :  { %225 = vmatpush.msk.msra.mxu1 %vm66_vm0, %v41_v3  ;;  %v39_v6 = vld [vmem:[%s425_s1 + $0xa0] sm:$0xff]  ;;  %v30_v7 = vld [vmem:[%s425_s1 + $0x58] sm:$0xff]  ;;  %v29_v9 = vld [vmem:[%s425_s1 + $0x50] sm:$0xff] }
   0x4   :  { %71 = vmatpush.msra.mxu0 %v33_v1  ;;  %v38_v8 = vld [vmem:[%s425_s1 + $0x98] sm:$0xff]  ;;  %v37_v11 = vld [vmem:[%s425_s1 + $0x90] sm:$0xff]  ;;  %v28_v12 = vld [vmem:[%s425_s1 + $0x48] sm:$0xff] }
   0x5   :  { %100 = vmatpush.msra.mxu1 %v40_v5  ;;  %v46_v10 = vld [vmem:[%s425_s1 + $0xd8] sm:$0xf]  ;;  %v36_v13 = vld [vmem:[%s425_s1 + $0x88] sm:$0xff]  ;;  %v27_v14 = vld [vmem:[%s425_s1 + $0x40] sm:$0xff] }
   0x6   :  { %72 = vmatpush.msra.mxu0 %v32_v2  ;;  %227 = vmatpush.msk.msra.mxu2 %vm66_vm0, %v46_v10  ;;  %v35_v15 = vld [vmem:[%s425_s1 + $0x80] sm:$0xff]  ;;  %v26_v16 = vld [vmem:[%s425_s1 + $0x38] sm:$0xff]  ;;  %v18_v17 = vld [vmem:[%s426_s0 + $0x8] sm:$0xff] }
   0x7   :  { %101 = vmatpush.msra.mxu1 %v39_v6  ;;  %v25_v18 = vld [vmem:[%s425_s1 + $0x30] sm:$0xff]  ;;  %v24_v19 = vld [vmem:[%s425_s1 + $0x28] sm:$0xff]  ;;  %v23_v20 = vld [vmem:[%s425_s1 + $0x20] sm:$0xff] }
   0x8   :  { %73 = vmatpush.msra.mxu0 %v31_v4  ;;  %v22_v21 = vld [vmem:[%s425_s1 + $0x18] sm:$0xff]  ;;  %v21_v22 = vld [vmem:[%s425_s1 + $0x10] sm:$0xff]  ;;  %v20_v23 = vld [vmem:[%s425_s1 + $0x8] sm:$0xff] }
   0x9   :  { %102 = vmatpush.msra.mxu1 %v38_v8  ;;  %v19_v24 = vld [vmem:[%s425_s1] sm:$0xff]  ;;  %v45_v26 = vld [vmem:[%s425_s1 + $0xd0] sm:$0xff]  ;;  %v44_v27 = vld [vmem:[%s425_s1 + $0xc8] sm:$0xff] }
   0xa   :  { %74 = vmatpush.msra.mxu0 %v30_v7  ;;  %v17_v25 = vld [vmem:[%s426_s0] sm:$0xff]  ;;  %131 = vmatpush.msra.mxu2 %v45_v26  ;;  %v42_v29 = vld [vmem:[%s425_s1 + $0xb8] sm:$0xff]  ;;  %v234_v32 = vld [vmem:[%s425_s1 + $0x130] ss:$0 sm:$0xff] }
   0xb   :  { %103 = vmatpush.msra.mxu1 %v37_v11  ;;  %v43_v28 = vld [vmem:[%s425_s1 + $0xc0] sm:$0xff]  ;;  %v50_v31 = vld [vmem:[%s425_s1 + $0xf8] sm:$0xff]  ;;  %v49_v38 = vld [vmem:[%s425_s1 + $0xf0] sm:$0xff] }
   0xc   :  { %75 = vmatpush.msra.mxu0 %v29_v9  ;;  %132 = vmatpush.msra.mxu2 %v44_v27  ;;  %v51_v30 = vld [vmem:[%s425_s1 + $0x100] sm:$0xf]  ;;  %v48_v39 = vld [vmem:[%s425_s1 + $0xe8] sm:$0xff]  ;;  %v54_v43 = vld [vmem:[%s425_s1 + $0x118] sm:$0xff] }
   0xd   :  { %104 = vmatpush.msra.mxu1 %v36_v13  ;;  %229 = vmatpush.msk.msra.mxu3 %vm66_vm0, %v51_v30  ;;  %v47_v40 = vld [vmem:[%s425_s1 + $0xe0] sm:$0xff]  ;;  %v56_v41 = vld [vmem:[%s425_s1 + $0x128] sm:$0xf]  ;;  %v235_v44 = vld [vmem:[%s425_s1 + $0x138] ss:$0 sm:$0xff] }
   0xe   :  { %76 = vmatpush.msra.mxu0 %v28_v12  ;;  %133 = vmatpush.msra.mxu2 %v43_v28  ;;  %v55_v42 = vld [vmem:[%s425_s1 + $0x120] sm:$0xff]  ;;  %v53_v48 = vld [vmem:[%s425_s1 + $0x110] sm:$0xff]  ;;  %v52_v49 = vld [vmem:[%s425_s1 + $0x108] sm:$0xff] }
   0xf   :  { %105 = vmatpush.msra.mxu1 %v35_v15  ;;  %159 = vmatpush.msra.mxu3 %v50_v31  ;;  %v236_v50 = vld [vmem:[%s425_s1 + $0x140] ss:$0 sm:$0xff]  ;;  %v237_v53 = vld [vmem:[%s425_s1 + $0x148] ss:$0 sm:$0xff] }
  0x10   :  { %77 = vmatpush.msra.mxu0 %v27_v14  ;;  %226 = vmatmul.msk.f32.vlgmr.msra.gmra.mxu1 %vm62_vm1, %v18_v17  ;;  %v195_v60 = vld [vmem:[%s428_s2] sm:$0xff] }
  0x11   :  { %134 = vmatpush.msra.mxu2 %v42_v29  ;;  %160 = vmatpush.msra.mxu3 %v49_v38 }
  0x12   :  { %78 = vmatpush.msra.mxu0 %v26_v16 }
  0x13   :  { %161 = vmatpush.msra.mxu3 %v48_v39  ;;  %231 = vmatpush.msk.msrb.mxu2 %vm66_vm0, %v56_v41 }
  0x14   :  { %79 = vmatpush.msra.mxu0 %v25_v18 }
  0x15   :  { %162 = vmatpush.msra.mxu3 %v47_v40  ;;  %186 = vmatpush.msrb.mxu2 %v55_v42 }
  0x16   :  { %80 = vmatpush.msra.mxu0 %v24_v19 }
  0x17   :  { %187 = vmatpush.msrb.mxu2 %v54_v43 }
  0x18   :  { %81 = vmatpush.msra.mxu0 %v23_v20 }
  0x19   :  { %188 = vmatpush.msrb.mxu2 %v53_v48 }
  0x1a   :  { %82 = vmatpush.msra.mxu0 %v22_v21 }
  0x1b   :  { %189 = vmatpush.msrb.mxu2 %v52_v49 }
  0x1c   :  { %83 = vmatpush.msra.mxu0 %v21_v22 }
  0x1e   :  { %84 = vmatpush.msra.mxu0 %v20_v23 }
  0x20   :  { %85 = vmatpush.msra.mxu0 %v19_v24 }
  0x21   :  { %86 = vmatmul.f32.vlgmr.msra.gmra.mxu0 %v17_v25 }
  0x8d   :  { %v107_v34 = vpop.f32.mrf.mxu1 }
  0x9e   :  { %v87_v33 = vpop.f32.mrf.mxu0 }
  0x9f   :  { %v88_v35 = vadd.f32 %v234_v32, %v87_v33 }
  0xa1   :  { %v108_v36 = vadd.f32 %v107_v34, %v88_v35 }
  0xa3   :  { %v110_v37 = vmax.f32 %v108_v36, 0.0 }
  0xa5   :  { %228 = vmatmul.msk.f32.vlgmr.msra.gmra.mxu2 %vm112_vm2, %v110_v37 }
 0x128   :  { %v136_v45 = vpop.f32.mrf.mxu2 }
 0x129   :  { %v137_v46 = vadd.f32 %v235_v44, %v136_v45 }
 0x12b   :  { %v139_v47 = vmax.f32 %v137_v46, 0.0 }
 0x12d   :  { %230 = vmatmul.msk.f32.vlgmr.msra.gmra.mxu3 %vm112_vm2, %v139_v47 }
 0x1b0   :  { %v164_v51 = vpop.f32.mrf.mxu3 }
 0x1b1   :  { %v165_v52 = vadd.f32 %v236_v50, %v164_v51 }
 0x1b3   :  { %232 = vmatmul.msk.f32.vlgmr.msrb.gmra.mxu2 %vm112_vm2, %v165_v52 }
 0x236   :  { %v191_v54 = vpop.f32.mrf.mxu2 }
 0x237   :  { %v192_v55 = vadd.f32 %v237_v53, %v191_v54 }
 0x239   :  { %v194_v56 = vmax.f32 %v192_v55, 0.0 }
 0x23b   :  { %v196_v57 = vmul.f32 0.5, %v194_v56  ;;  %206 = vst.msk [vmem:[%s427_s3] sm:$0xff] %vm205_vm3, %v194_v56 }
 0x23d   :  { %v197_v58 = vmul.f32 1.442695, %v196_v57 }
 0x23f   :  { %238 = vpow2.f32 %v197_v58 }
 0x245   :  { %v239_v59 = vpop.eup %238 }
 0x246   :  { %200 = vrot.lane.b32.xlu0 %v239_v59, %s240_s6 }
 0x24e   :  { %208 = vrot.lane.b32.xlu0 %v194_v56, %s240_s6 }
 0x2b8   :  { %v201_v61 = vpop.permute.xlu0 %200 }
 0x2b9   :  { %v203_v62 = vmul.f32 %v201_v61, %v195_v60 }
 0x2bb   :  { %v204_v63 = vadd.f32 %v203_v62, %v194_v56 }
 0x2bd   :  { %212 = vst.msk [vmem:[%s429_s5] sm:$0xff] %vm205_vm3, %v204_v63 }
 0x2c0   :  { %v209_v0 = vpop.permute.xlu0 %208 }
 0x2c1   :  { %211 = vst.msk [vmem:[%s430_s4] sm:$0xff] %vm205_vm3, %v209_v0 }

</bundles_post_ra>
